<compile_context>
chip_gen: v7x
topology: tpu7x:2x2x1
jax: 0.10.0
libtpu: 0.0.40
codegen_flags: <defaults>
</compile_context>

<pallas_src>
import functools

import jax
import jax.numpy as jnp
from jax.experimental import pallas as pl
from jax.experimental.pallas import tpu as pltpu


# ----------------------------------------------------------------------------
# Kernel
# ----------------------------------------------------------------------------
def _evonorm_s0_kernel(x_ref, p_ref, o_ref, *, eps):
    # x_ref: (tile_rows, HW) -- one full reduction group per row.
    # p_ref: (tile_rows, 3)  -- packed [gamma, beta, v] per row.
    x = x_ref[...].astype(jnp.float32)
    n = x.shape[-1]

    mean = jnp.mean(x, axis=-1, keepdims=True)
    diff = x - mean
    # torch.var default is unbiased (divide by N-1). Guard N==1 degenerate case.
    inv_denom = 1.0 / float(max(n - 1, 1))
    var = jnp.sum(diff * diff, axis=-1, keepdims=True) * inv_denom
    inv_std = jax.lax.rsqrt(var + eps)          # EUP slot, keeps VALU free
    y = diff * inv_std

    p = p_ref[...].astype(jnp.float32)
    g = p[:, 0:1]
    b = p[:, 1:2]
    vv = p[:, 2:3]

    o_ref[...] = (g * (y * jax.nn.sigmoid(vv * y)) + b).astype(o_ref.dtype)


# ----------------------------------------------------------------------------
# Pure-JAX reference (also used as large-spatial-extent fallback)
# ----------------------------------------------------------------------------
def evonorm_s0_ref(x, gamma, beta, v, eps=1e-5):
    mean = jnp.mean(x, axis=(2, 3), keepdims=True)
    var = jnp.var(x, axis=(2, 3), keepdims=True, ddof=1)   # torch unbiased var
    std = jnp.sqrt(var + eps)
    y = (x - mean) / std
    return gamma * y * jax.nn.sigmoid(v * y) + beta


# ----------------------------------------------------------------------------
# Wrapper
# ----------------------------------------------------------------------------
def evonorm_s0(x, gamma, beta, v, *, eps=1e-5):
    """EvoNormS0 forward. x: (B, C, H, W); gamma/beta/v: (1, C, 1, 1)."""
    B, C, H, W = x.shape
    HW = H * W
    rows = B * C
    orig_dtype = x.dtype
    itemsize = jnp.dtype(orig_dtype).itemsize

    # --- Generation-aware VMEM budget ---------------------------------------
    try:
        vmem_capacity = int(pltpu.get_tpu_info().vmem_capacity_bytes)
    except Exception:
        vmem_capacity = 64 * 1024 * 1024        # conservative (v7x per-core)

    # Per-row VMEM cost estimate: double-buffered in + out native blocks plus
    # ~4 f32-sized in-kernel temporaries (x_f32 / diff / y / out).
    per_row_budget_bytes = 4 * HW * itemsize + 4 * HW * 4
    vmem_budget = int(0.70 * vmem_capacity)

    # --- Tile selection ------------------------------------------------------
    if rows < 8:
        tile_rows = rows                         # full row extent (allowed)
    else:
        tile_rows = max(8, (vmem_budget // per_row_budget_bytes) // 8 * 8)
        tile_rows = min(tile_rows, (rows // 8) * 8)
        # Guarantee enough grid steps for pipeline overlap / 2-TC sharding.
        min_steps = 4
        if rows >= 8 * min_steps:
            tile_rows = min(tile_rows, max(8, ((rows // min_steps) // 8) * 8))

    if tile_rows * per_row_budget_bytes > vmem_budget:
        # TODO(synk): for spatial extents too large for even an (8, HW) block,
        # add a second "arbitrary" grid axis over HW with running sum /
        # sum-of-squares VMEM scratch and a finalize pass; fall back for now.
        return evonorm_s0_ref(x, gamma, beta, v, eps)

    grid = (pl.cdiv(rows, tile_rows),)

    # --- Free-metadata 2-D views + tiny packed params ------------------------
    x2d = x.reshape(rows, HW)
    params_c = jnp.concatenate(
        [gamma.reshape(C, 1), beta.reshape(C, 1), v.reshape(C, 1)], axis=1)   # (C, 3)
    params = jnp.broadcast_to(params_c[None, :, :], (B, C, 3)).reshape(rows, 3)
    p_itemsize = jnp.dtype(params.dtype).itemsize

    # --- VMEM limit from the real footprint ----------------------------------
    footprint = (tile_rows * per_row_budget_bytes
                 + 4 * tile_rows * 3 * p_itemsize
                 + (4 << 20))
    vmem_limit = int(min(vmem_capacity, max(32 * 1024 * 1024, footprint)))

    kernel = functools.partial(_evonorm_s0_kernel, eps=float(eps))

    out2d = pl.pallas_call(
        kernel,
        out_shape=jax.ShapeDtypeStruct((rows, HW), orig_dtype),
        grid_spec=pltpu.PrefetchScalarGridSpec(
            num_scalar_prefetch=0,
            grid=grid,
            in_specs=[
                pl.BlockSpec((tile_rows, HW), lambda i: (i, 0)),
                pl.BlockSpec((tile_rows, 3), lambda i: (i, 0)),
            ],
            out_specs=pl.BlockSpec((tile_rows, HW), lambda i: (i, 0)),
        ),
        compiler_params=pltpu.CompilerParams(
            dimension_semantics=("parallel",),
            vmem_limit_bytes=vmem_limit,
        ),
    )(x2d, params)

    return out2d.reshape(B, C, H, W)


if __name__ == "__main__":
    k1, k2, k3, k4 = jax.random.split(jax.random.PRNGKey(0), 4)
    B, C, H, W = 2, 4, 16, 16
    x = jax.random.normal(k1, (B, C, H, W), dtype=jnp.float32)
    # Module init is ones/zeros/ones; random values exercise the per-channel
    # affine / gating paths.
    gamma = jax.random.normal(k2, (1, C, 1, 1), dtype=jnp.float32)
    beta = jax.random.normal(k3, (1, C, 1, 1), dtype=jnp.float32)
    v = jax.random.normal(k4, (1, C, 1, 1), dtype=jnp.float32)

    out = evonorm_s0(x, gamma, beta, v, eps=1e-5)
    out = jax.block_until_ready(out)

    ref = evonorm_s0_ref(x, gamma, beta, v, eps=1e-5)
    assert out.shape == x.shape
    assert out.dtype == x.dtype
    assert jnp.allclose(out, ref, atol=1e-5, rtol=1e-5)

    print("KERNEL_OK")
</pallas_src>

<mosaic_0001>
module attributes {stable_mosaic.version = 11 : i64} {
  func.func @_evonorm_s0_kernel(%arg0: i32, %arg1: memref<8x256xf32, #tpu.memory_space<vmem>>, %arg2: memref<8x3xf32, #tpu.memory_space<vmem>>, %arg3: memref<8x256xf32, #tpu.memory_space<vmem>>) attributes {dimension_semantics = [#tpu.dimension_semantics<parallel>], iteration_bounds = array<i64: 1>, scalar_prefetch = 0 : i64, scratch_operands = 0 : i64, tpu.core_type = #tpu.core_type<tc>, window_params = [{transform_indices = @transform_0, window_bounds = array<i64: 8, 256>}, {transform_indices = @transform_1, window_bounds = array<i64: 8, 3>}, {transform_indices = @transform_2, window_bounds = array<i64: 8, 256>}]} {
    %c0 = arith.constant 0 : index
    %c0_0 = arith.constant 0 : index
    %0 = vector.load %arg1[%c0, %c0_0] : memref<8x256xf32, #tpu.memory_space<vmem>>, vector<8x256xf32>
    %cst = arith.constant dense<0.000000e+00> : vector<8xf32>
    %1 = vector.multi_reduction <add>, %0, %cst [1] : vector<8x256xf32> to vector<8xf32>
    %2 = vector.shape_cast %1 : vector<8xf32> to vector<8x1xf32>
    %cst_1 = arith.constant 2.560000e+02 : f32
    %3 = vector.broadcast %cst_1 : f32 to vector<8x1xf32>
    %4 = arith.divf %2, %3 : vector<8x1xf32>
    %5 = vector.broadcast %4 : vector<8x1xf32> to vector<8x256xf32>
    %6 = arith.subf %0, %5 : vector<8x256xf32>
    %7 = arith.mulf %6, %6 : vector<8x256xf32>
    %cst_2 = arith.constant dense<0.000000e+00> : vector<8xf32>
    %8 = vector.multi_reduction <add>, %7, %cst_2 [1] : vector<8x256xf32> to vector<8xf32>
    %9 = vector.shape_cast %8 : vector<8xf32> to vector<8x1xf32>
    %cst_3 = arith.constant 0.00392156886 : f32
    %10 = vector.broadcast %cst_3 : f32 to vector<8x1xf32>
    %11 = arith.mulf %9, %10 : vector<8x1xf32>
    %cst_4 = arith.constant 9.99999974E-6 : f32
    %12 = vector.broadcast %cst_4 : f32 to vector<8x1xf32>
    %13 = arith.addf %11, %12 : vector<8x1xf32>
    %14 = math.rsqrt %13 : vector<8x1xf32>
    %15 = vector.broadcast %14 : vector<8x1xf32> to vector<8x256xf32>
    %16 = arith.mulf %6, %15 : vector<8x256xf32>
    %c0_5 = arith.constant 0 : index
    %c0_6 = arith.constant 0 : index
    %17 = vector.load %arg2[%c0_5, %c0_6] : memref<8x3xf32, #tpu.memory_space<vmem>>, vector<8x3xf32>
    %18 = vector.extract_strided_slice %17 {offsets = [0, 0], sizes = [8, 1], strides = [1, 1]} : vector<8x3xf32> to vector<8x1xf32>
    %19 = vector.extract_strided_slice %17 {offsets = [0, 1], sizes = [8, 1], strides = [1, 1]} : vector<8x3xf32> to vector<8x1xf32>
    %20 = vector.extract_strided_slice %17 {offsets = [0, 2], sizes = [8, 1], strides = [1, 1]} : vector<8x3xf32> to vector<8x1xf32>
    %21 = vector.broadcast %20 : vector<8x1xf32> to vector<8x256xf32>
    %22 = arith.mulf %21, %16 : vector<8x256xf32>
    %23 = arith.negf %22 : vector<8x256xf32>
    %24 = math.exp %23 : vector<8x256xf32>
    %cst_7 = arith.constant 1.000000e+00 : f32
    %25 = vector.broadcast %cst_7 : f32 to vector<8x256xf32>
    %26 = arith.addf %25, %24 : vector<8x256xf32>
    %27 = arith.divf %25, %26 : vector<8x256xf32>
    %28 = arith.mulf %16, %27 : vector<8x256xf32>
    %29 = vector.broadcast %18 : vector<8x1xf32> to vector<8x256xf32>
    %30 = arith.mulf %29, %28 : vector<8x256xf32>
    %31 = vector.broadcast %19 : vector<8x1xf32> to vector<8x256xf32>
    %32 = arith.addf %30, %31 : vector<8x256xf32>
    %c0_8 = arith.constant 0 : index
    %c0_9 = arith.constant 0 : index
    %33 = vector.load %arg3[%c0_8, %c0_9] : memref<8x256xf32, #tpu.memory_space<vmem>>, vector<8x256xf32>
    tpu.vector_store %arg3[%c0_8, %c0_9], %32 {strides = array<i32>} : memref<8x256xf32, #tpu.memory_space<vmem>>, vector<8x256xf32>,
    return
  }
  func.func @transform_0(%arg0: i32) -> (i32, i32) {
    %c0_i32 = arith.constant 0 : i32
    %c0_i32_0 = arith.constant 0 : i32
    return %arg0, %c0_i32 : i32, i32
  }
  func.func @transform_1(%arg0: i32) -> (i32, i32) {
    %c0_i32 = arith.constant 0 : i32
    %c0_i32_0 = arith.constant 0 : i32
    return %arg0, %c0_i32 : i32, i32
  }
  func.func @transform_2(%arg0: i32) -> (i32, i32) {
    %c0_i32 = arith.constant 0 : i32
    %c0_i32_0 = arith.constant 0 : i32
    return %arg0, %c0_i32 : i32, i32
  }
}

</mosaic_0001>

<bundles_post_ra>
// kernel: tpu_custom_call.1
= control target key start
LH: loop header
LB: loop body
LE: loop exit
PB: predicated region body
PF: predicated region fallthrough
CT: control target
= control target key end

     0   :  { %7 = vsyncpa [#allocation3], 0  ;;  %s209_s0 = inlined_call_operand.hbm [shape: f32[8,256], index: 0, kind: input, shape index: {}]   ;;  %s210_s1 = inlined_call_operand.vmem [shape: f32[8,3], index: 1, kind: input, shape index: {}]   ;;  %s211_s2 = inlined_call_operand.hbm [shape: f32[8,256], index: 2, kind: output, shape index: {}]  }
   0x1   :  { %8 = vsyncpa [#allocation4], 0  ;;  %s162_s9 = smov [#allocation2]   ;;  %s114_s13 = scalar_lea.hbm %s209_s0, 256 }
   0x2   :  { %s15_s10 = sshll.u32 %s162_s9, 4  ;;  %p115_p0 = scmp.ne.s32.totalorder %s209_s0, %s114_s13  ;;  %s16_s10 = int_to_ptr.vmem [resolvable:$true] %s15_s10 }
   0x3   :  { %p118_p1 = scmp.lt.u32.totalorder %s114_s13, %s209_s0 }
   0x5   :  { %p120_p2 = pnand %p118_p1, %p115_p0 }
   0x7   :  { %123 = shalt.err (!%p120_p2)
}
   0x8   :  { %s124_s18 = scalar_lea.vmem %s16_s10, 256  ;;  %p129_p4 = scmp.lt.s32.totalorder %s16_s10, %s16_s10 }
   0x9   :  { %p125_p3 = scmp.ne.s32.totalorder %s16_s10, %s124_s18  ;;  %p130_p5 = scmp.lt.s32.totalorder %s124_s18, %s124_s18 }
   0xb   :  { %p131_p6 = por %p130_p5, %p129_p4 }
   0xd   :  { %p132_p7 = pnand %p131_p6, %p125_p3 }
   0xf   :  { %135 = shalt.err (!%p132_p7)
}
  0x10   :  { %18 = dma.hbm_to_vmem [thread:$0]  %s209_s0, 256, %s16_s10, [#allocation3]  }
  0x11   :  { %158 = dma.done.wait [#allocation3], 256  }
  0x12   :  { %159 = vsyncadd [#allocation3], 4294967040  ;;  %v24_v0 = vld [vmem:[#allocation2] sm:$0xff]  ;;  %v25_v1 = vld [vmem:[#allocation2 + $0x8] sm:$0xff]  ;;  %v163_v4 = vmov 2   ;;  %v164_v5 = vmov 1  }
  0x13   :  { %v26_v2 = vadd.f32 %v25_v1, %v24_v0  ;;  %v43_v3 = vld [vmem:[%s210_s1] sm:$0xff]  ;;  %101 = vset.pattern.permute.xlu1 %v163_v4  ;;  %103 = vset.pattern.permute.xlu0 %v164_v5  ;;  %v165_v6 = vmov 0   ;;  %s166_s0 = smov [#allocation5]  }
  0x14   :  { %46 = vperm.xlu1 %101, %v43_v3   ;;  %s85_s1 = sshll.u32 %s166_s0, 4  ;;  %s86_s1 = int_to_ptr.vmem [resolvable:$true] %s85_s1 }
  0x15   :  { %27 = vadd.xlane.f32.xlu0 %v26_v2  ;;  %s136_s23 = scalar_lea.vmem %s86_s1, 256  ;;  %p141_p9 = scmp.lt.s32.totalorder %s86_s1, %s86_s1 }
  0x16   :  { %p137_p8 = scmp.ne.s32.totalorder %s86_s1, %s136_s23  ;;  %p142_p10 = scmp.lt.s32.totalorder %s136_s23, %s136_s23 }
  0x18   :  { %102 = vset.pattern.permute.xlu1 %v165_v6  ;;  %p143_p11 = por %p142_p10, %p141_p9 }
  0x19   :  { %66 = vperm.xlu1 %102, %v43_v3  }
  0x1a   :  { %p144_p12 = pnand %p143_p11, %p137_p8 }
  0x93   :  { %v47_v18 = vpop.permute.xlu1 %46 }
  0x98   :  { %v67_v30 = vpop.permute.xlu1 %66 }
  0xa2   :  { %v28_v7 = vpop.xlane.xlu0 %27 }
  0xa3   :  { %v30_v8 = vmul.f32 0.00390625, %v28_v7 }
  0xa5   :  { %v31_v9 = vsub.f32 %v24_v0, %v30_v8  ;;  %v32_v10 = vsub.f32 %v25_v1, %v30_v8 }
  0xa7   :  { %v33_v11 = vmul.f32 %v31_v9, %v31_v9  ;;  %v34_v12 = vmul.f32 %v32_v10, %v32_v10 }
  0xa9   :  { %v35_v13 = vadd.f32 %v34_v12, %v33_v11 }
  0xab   :  { %36 = vadd.xlane.f32.xlu0 %v35_v13 }
  0xc1   :  { %72 = vperm.xlu0 %103, %v43_v3  }
 0x138   :  { %v37_v14 = vpop.xlane.xlu0 %36 }
 0x139   :  { %v38_v15 = vmul.f32 0.003921569, %v37_v14 }
 0x13b   :  { %v39_v16 = vadd.f32 1e-05, %v38_v15 }
 0x13d   :  { %104 = vrsqrt.f32 %v39_v16 }
 0x140   :  { %v73_v34 = vpop.permute.xlu0 %72 }
 0x147   :  { %v105_v17 = vpop.eup %104 }
 0x148   :  { %v41_v19 = vmul.f32 %v105_v17, %v31_v9  ;;  %v42_v20 = vmul.f32 %v105_v17, %v32_v10 }
 0x14a   :  { %v49_v21 = vmul.f32 %v47_v18, %v41_v19  ;;  %v50_v22 = vmul.f32 %v47_v18, %v42_v20 }
 0x14c   :  { %v94_v23 = vmul.f32 -1.442695, %v49_v21  ;;  %v95_v24 = vmul.f32 -1.442695, %v50_v22 }
 0x14e   :  { %106 = vpow2.f32 %v94_v23 }
 0x14f   :  { %108 = vpow2.f32 %v95_v24 }
 0x158   :  { %v107_v25 = vpop.eup %106 }
 0x159   :  { %v109_v26 = vpop.eup %108  ;;  %v57_v27 = vadd.f32 1.0, %v107_v25 }
 0x15a   :  { %v58_v28 = vadd.f32 1.0, %v109_v26 }
 0x15b   :  { %110 = vrcp.f32 %v57_v27 }
 0x15c   :  { %112 = vrcp.f32 %v58_v28 }
 0x165   :  { %v111_v29 = vpop.eup %110 }
 0x166   :  { %v113_v31 = vpop.eup %112  ;;  %v63_v32 = vmul.f32 %v111_v29, %v41_v19 }
 0x167   :  { %v64_v33 = vmul.f32 %v113_v31, %v42_v20 }
 0x168   :  { %v69_v35 = vmul.f32 %v67_v30, %v63_v32 }
 0x169   :  { %v70_v36 = vmul.f32 %v67_v30, %v64_v33 }
 0x16a   :  { %v75_v37 = vadd.f32 %v73_v34, %v69_v35 }
 0x16b   :  { %v76_v38 = vadd.f32 %v73_v34, %v70_v36 }
 0x16c   :  { %77 = vst [vmem:[#allocation5] sm:$0xff] %v75_v37 }
 0x16d   :  { %78 = vst [vmem:[#allocation5 + $0x8] sm:$0xff] %v76_v38 }
 0x16e   :  { %147 = shalt.err (!%p144_p12)
}
 0x16f   :  { %s148_s26 = scalar_lea.hbm %s211_s2, 256 }
 0x170   :  { %p149_p13 = scmp.ne.s32.totalorder %s211_s2, %s148_s26  ;;  %p152_p0 = scmp.lt.u32.totalorder %s148_s26, %s211_s2 }
 0x172   :  { %p154_p1 = pnand %p152_p0, %p149_p13 }
 0x174   :  { %157 = shalt.err (!%p154_p1)
}
 0x175   :  { %88 = dma.vmem_to_hbm [thread:$0]  %s86_s1, 256, %s211_s2, [#allocation4]  }
 0x176   :  { %160 = dma.done.wait [#allocation4], 256  }
 0x177   :  { %161 = vsyncadd [#allocation4], 4294967040 }
 0x178   :  { %92 = vsyncpa [#allocation3], 1 }
 0x179   :  { %93 = vsyncpa [#allocation4], 1 }

</bundles_post_ra>
